<compile_context>
chip_gen: v6e
topology: v6e:2x2x1
jax: 0.10.0
libtpu: 0.0.40
codegen_flags: <defaults>
</compile_context>

<pallas_src>
import functools

import jax
import jax.numpy as jnp
from jax.experimental import pallas as pl
from jax.experimental.pallas import tpu as pltpu

EPS = 1e-5          # PyTorch BatchNorm2d default
LANE_TILE = 512     # lane-axis tile for the large-shape fallback path


def _round_up(x, m):
    return ((x + m - 1) // m) * m


def _vmem_capacity_bytes():
    try:
        info = pltpu.get_tpu_info()
        cap = int(getattr(info, "vmem_capacity_bytes", 0))
        if cap > 0:
            return cap
    except Exception:
        pass
    return 64 * 1024 * 1024          # conservative default (v7x physical per-core VMEM)


def _vmem_limit_bytes(cap, est):
    return int(min(int(cap * 0.9), max(32 << 20, est + (16 << 20))))


def _pick_spatial_tile(mo, cin):
    """Lane-axis tiling for the fallback path: either one full-width block (block dim ==
    full array dim, so any mo is legal) or LANE_TILE-wide blocks with mo padded up.
    Never the tiny-tile degradation the review flagged."""
    if mo <= 4096 and cin * mo * 4 <= (2 << 20):
        return mo, mo
    return LANE_TILE, _round_up(mo, LANE_TILE)


# --------------------------- fused single-kernel path ---------------------------

def _fused_conv_bn_kernel(x_ref, w_ref, g_ref, b_ref, o_ref, s_ref, q_ref, *, inv_m, eps):
    """1x1 conv (channels-first GEMM) + batch-stat accumulation + in-place BN apply.

    x_ref: (1, Cin, Mo)   this batch element's (strided) input, spatial on lanes
    w_ref: (Cout, Cin)    conv weight
    g_ref/b_ref: (Cout,1) BN gamma / beta
    o_ref: (N, Cout, Mo)  FULL output, VMEM-resident for the whole grid (flushed once)
    s_ref/q_ref: (Cout,1) running sum / sum-of-squares of z over (batch, spatial)
    """
    n = pl.program_id(0)

    @pl.when(n == 0)
    def _init():
        s_ref[...] = jnp.zeros_like(s_ref)
        q_ref[...] = jnp.zeros_like(q_ref)

    z = jnp.dot(w_ref[...], x_ref[0], preferred_element_type=jnp.float32)   # (Cout, Mo)
    o_ref[n] = z                                   # dynamic leading-axis store only
    s_ref[...] += jnp.sum(z, axis=1, keepdims=True)
    q_ref[...] += jnp.sum(z * z, axis=1, keepdims=True)

    @pl.when(n == pl.num_programs(0) - 1)
    def _finalize():
        mean = s_ref[...] * inv_m                          # mean of z (conv bias cancels)
        var = q_ref[...] * inv_m - mean * mean             # biased batch variance
        scale = g_ref[...] * jax.lax.rsqrt(var + eps)      # (Cout, 1)
        shift = b_ref[...] - mean * scale
        o_ref[...] = o_ref[...] * scale[None] + shift[None]


def _fused_forward(xs, w, gamma2, beta2, m_valid, vmem_limit):
    n, cin, mo = xs.shape
    cout = w.shape[0]
    kernel = functools.partial(_fused_conv_bn_kernel, inv_m=1.0 / float(m_valid), eps=EPS)
    return pl.pallas_call(
        kernel,
        out_shape=jax.ShapeDtypeStruct((n, cout, mo), jnp.float32),
        grid=(n,),
        in_specs=[
            pl.BlockSpec((1, cin, mo), lambda i: (i, 0, 0)),
            pl.BlockSpec((cout, cin), lambda i: (0, 0)),
            pl.BlockSpec((cout, 1), lambda i: (0, 0)),
            pl.BlockSpec((cout, 1), lambda i: (0, 0)),
        ],
        # Constant index_map: output stays resident in VMEM across all grid steps and is
        # written to HBM exactly once, after the in-place BN apply at the last step.
        out_specs=pl.BlockSpec((n, cout, mo), lambda i: (0, 0, 0)),
        scratch_shapes=[pltpu.VMEM((cout, 1), jnp.float32),
                        pltpu.VMEM((cout, 1), jnp.float32)],
        compiler_params=pltpu.CompilerParams(
            # stats + resident output accumulate across the batch axis -> sequential.
            dimension_semantics=("arbitrary",),
            vmem_limit_bytes=vmem_limit),
    )(xs, w, gamma2, beta2)


# ----------------------- large-shape two-kernel fallback ------------------------

def _gemm_stats_kernel(x_ref, w_ref, z_ref, s_ref, q_ref):
    """z = w @ x (bf16 intermediate) + per-batch partial sum / sum-of-squares (f32)."""
    @pl.when(pl.program_id(1) == 0)
    def _init():
        s_ref[...] = jnp.zeros_like(s_ref)
        q_ref[...] = jnp.zeros_like(q_ref)

    z = jnp.dot(w_ref[...], x_ref[0], preferred_element_type=jnp.float32)   # (Cout, tile_m)
    z_ref[0] = z.astype(z_ref.dtype)
    s_ref[...] += jnp.sum(z, axis=1, keepdims=True)[None]
    q_ref[...] += jnp.sum(z * z, axis=1, keepdims=True)[None]


def _bn_apply_kernel(z_ref, sc_ref, sh_ref, o_ref):
    o_ref[0] = z_ref[0].astype(jnp.float32) * sc_ref[...] + sh_ref[...]


def _two_pass_forward(xs, w, gamma2, beta2, m_valid, tile_m, vmem_limit):
    n, cin, mp = xs.shape
    cout = w.shape[0]
    grid = (n, mp // tile_m)

    z, s_part, q_part = pl.pallas_call(
        _gemm_stats_kernel,
        out_shape=(jax.ShapeDtypeStruct((n, cout, mp), jnp.bfloat16),
                   jax.ShapeDtypeStruct((n, cout, 1), jnp.float32),
                   jax.ShapeDtypeStruct((n, cout, 1), jnp.float32)),
        grid=grid,
        in_specs=[
            pl.BlockSpec((1, cin, tile_m), lambda i, t: (i, 0, t)),
            pl.BlockSpec((cout, cin), lambda i, t: (0, 0)),
        ],
        out_specs=(
            pl.BlockSpec((1, cout, tile_m), lambda i, t: (i, 0, t)),
            pl.BlockSpec((1, cout, 1), lambda i, t: (i, 0, 0)),
            pl.BlockSpec((1, cout, 1), lambda i, t: (i, 0, 0)),
        ),
        compiler_params=pltpu.CompilerParams(
            # per-batch partial stats -> batch axis is safely "parallel" (v7x megacore);
            # spatial axis accumulates into the resident s/q blocks -> "arbitrary".
            dimension_semantics=("parallel", "arbitrary"),
            vmem_limit_bytes=vmem_limit),
    )(xs, w)

    inv_m = 1.0 / float(m_valid)
    mean = jnp.sum(s_part[:, :, 0], axis=0) * inv_m                 # (Cout,)
    var = jnp.sum(q_part[:, :, 0], axis=0) * inv_m - mean * mean    # biased variance
    scale = gamma2[:, 0] * jax.lax.rsqrt(var + EPS)
    shift = beta2[:, 0] - mean * scale

    return pl.pallas_call(
        _bn_apply_kernel,
        out_shape=jax.ShapeDtypeStruct((n, cout, mp), jnp.float32),
        grid=grid,
        in_specs=[
            pl.BlockSpec((1, cout, tile_m), lambda i, t: (i, 0, t)),
            pl.BlockSpec((cout, 1), lambda i, t: (0, 0)),
            pl.BlockSpec((cout, 1), lambda i, t: (0, 0)),
        ],
        out_specs=pl.BlockSpec((1, cout, tile_m), lambda i, t: (i, 0, t)),
        compiler_params=pltpu.CompilerParams(
            dimension_semantics=("parallel", "parallel"),
            vmem_limit_bytes=vmem_limit),
    )(z, scale.reshape(cout, 1), shift.reshape(cout, 1))


# ------------------------------- module forward ---------------------------------

def shortcut_projection(x_nchw, params, stride, path="auto"):
    """BatchNorm2d(Conv2d(x, kernel=1, stride)) with training-mode batch statistics.

    x_nchw: (N, Cin, H, W) NCHW  ->  (N, Cout, Ho, Wo) NCHW.  No wrapper transposes.
    """
    n, cin, _, _ = x_nchw.shape
    w = params["w"].astype(jnp.float32)                       # (Cout, Cin)
    cout = w.shape[0]
    gamma2 = params["gamma"].reshape(cout, 1).astype(jnp.float32)
    beta2 = params["beta"].reshape(cout, 1).astype(jnp.float32)
    # NOTE: params["b"] (the conv bias) is intentionally unused: it cancels exactly in
    # conv+BN because  (z + b) - mean(z + b) == z - mean(z)  and  var(z + b) == var(z).

    xs = x_nchw if stride == 1 else x_nchw[:, :, ::stride, ::stride]
    xs = xs.astype(jnp.float32)
    ho, wo = xs.shape[2], xs.shape[3]
    mo = ho * wo
    xs = xs.reshape(n, cin, mo)            # row-major merge of (Ho, Wo): layout no-op
    m_valid = n * mo

    cap = _vmem_capacity_bytes()
    # conservative estimate: resident output (x2 in case it is double buffered),
    # double-buffered per-batch input slab, weight + BN params.
    est_fused = 4 * (2 * n * cout * mo + 2 * cin * mo + cout * cin + 4 * cout)
    use_fused = (path == "fused") or (path == "auto" and est_fused <= cap // 2)

    if use_fused:
        out = _fused_forward(xs, w, gamma2, beta2, m_valid,
                             _vmem_limit_bytes(cap, est_fused))
    else:
        tile_m, mp = _pick_spatial_tile(mo, cin)
        if mp != mo:
            # zero columns contribute 0 to both stats sums; sliced off below.
            xs = jnp.pad(xs, ((0, 0), (0, 0), (0, mp - mo)))
        out = _two_pass_forward(xs, w, gamma2, beta2, m_valid, tile_m,
                                _vmem_limit_bytes(cap, 0))
        if mp != mo:
            out = out[:, :, :mo]

    return out.reshape(n, cout, ho, wo)


# ------------------------------------ params -------------------------------------

def init_params(key, in_ch, out_ch):
    k0, k1, k2 = jax.random.split(key, 3)
    w_pt = jax.random.normal(k0, (out_ch, in_ch, 1, 1), dtype=jnp.float32) * 0.2
    b = jax.random.normal(k1, (out_ch,), dtype=jnp.float32) * 0.1
    gamma = 1.0 + 0.1 * jax.random.normal(k2, (out_ch,), dtype=jnp.float32)
    beta = jnp.linspace(-0.1, 0.1, out_ch, dtype=jnp.float32)
    return {
        "w_pt": w_pt,                 # PyTorch Conv2d weight layout (Cout, Cin, 1, 1)
        "w": w_pt[:, :, 0, 0],        # kernel GEMM layout (Cout, Cin) -- no transpose needed
        "b": b,                       # conv bias (cancels exactly in conv+BN; kept for the ref)
        "gamma": gamma,
        "beta": beta,
    }


def reference(x_nchw, params, stride):
    """Plain-JAX bn(conv(x)) with training-mode batch statistics.  Includes the conv bias,
    which must cancel against the kernel's bias-free formulation."""
    x = x_nchw[:, :, ::stride, ::stride].astype(jnp.float32)
    w = params["w_pt"][:, :, 0, 0]                            # (Cout, Cin)
    y = jnp.einsum("ncij,oc->noij", x, w, precision=jax.lax.Precision.HIGHEST)
    y = y + params["b"][None, :, None, None]
    mean = y.mean(axis=(0, 2, 3))
    var = y.var(axis=(0, 2, 3))                               # biased, as BN normalization uses
    yhat = (y - mean[None, :, None, None]) * jax.lax.rsqrt(var + EPS)[None, :, None, None]
    return yhat * params["gamma"][None, :, None, None] + params["beta"][None, :, None, None]


# ------------------------------------- main --------------------------------------

if __name__ == "__main__":
    in_ch, out_ch, stride = 4, 16, 2
    key = jax.random.PRNGKey(0)
    kx, kp = jax.random.split(key)
    x = jax.random.normal(kx, (2, in_ch, 16, 16), dtype=jnp.float32)   # NCHW
    params = init_params(kp, in_ch, out_ch)

    ref = reference(x, params, stride)

    # primary path: single fused kernel (conv output never round-trips through HBM)
    fwd = jax.jit(functools.partial(shortcut_projection, stride=stride, path="auto"))
    out = fwd(x, params)
    jax.block_until_ready(out)
    assert out.shape == (2, out_ch, 8, 8), out.shape
    assert bool(jnp.all(jnp.isfinite(out)))
    err = float(jnp.max(jnp.abs(out - ref)))
    assert bool(jnp.allclose(out, ref, rtol=5e-2, atol=5e-2)), err

    # also exercise the large-shape fallback (2 kernels, bf16 intermediate) at the toy size
    fwd_tp = jax.jit(functools.partial(shortcut_projection, stride=stride, path="two_pass"))
    out_tp = fwd_tp(x, params)
    jax.block_until_ready(out_tp)
    err_tp = float(jnp.max(jnp.abs(out_tp - ref)))
    assert bool(jnp.allclose(out_tp, ref, rtol=5e-2, atol=5e-2)), err_tp

    print("KERNEL_OK")
</pallas_src>

<mosaic_0001>
module attributes {stable_mosaic.version = 11 : i64} {
  func.func @_fused_conv_bn_kernel(%arg0: i32, %arg1: memref<1x4x64xf32, #tpu.memory_space<vmem>>, %arg2: memref<16x4xf32, #tpu.memory_space<vmem>>, %arg3: memref<16x1xf32, #tpu.memory_space<vmem>>, %arg4: memref<16x1xf32, #tpu.memory_space<vmem>>, %arg5: memref<2x16x64xf32, #tpu.memory_space<vmem>>, %arg6: memref<16x1xf32, #tpu.memory_space<vmem>>, %arg7: memref<16x1xf32, #tpu.memory_space<vmem>>) attributes {dimension_semantics = [#tpu.dimension_semantics<arbitrary>], iteration_bounds = array<i64: 2>, scalar_prefetch = 0 : i64, scratch_operands = 2 : i64, tpu.core_type = #tpu.core_type<tc>, window_params = [{transform_indices = @transform_0, window_bounds = array<i64: 1, 4, 64>}, {pipeline_mode = #tpu.pipeline_mode<synchronous>, transform_indices = @transform_1, window_bounds = array<i64: 16, 4>}, {pipeline_mode = #tpu.pipeline_mode<synchronous>, transform_indices = @transform_2, window_bounds = array<i64: 16, 1>}, {pipeline_mode = #tpu.pipeline_mode<synchronous>, transform_indices = @transform_3, window_bounds = array<i64: 16, 1>}, {pipeline_mode = #tpu.pipeline_mode<synchronous>, transform_indices = @transform_4, window_bounds = array<i64: 2, 16, 64>}]} {
    %c0_i32 = arith.constant 0 : i32
    %0 = arith.cmpi eq, %arg0, %c0_i32 : i32
    %1 = arith.extui %0 : i1 to i32
    %c0_i32_0 = arith.constant 0 : i32
    %2 = arith.cmpi ne, %1, %c0_i32_0 : i32
    scf.if %2 {
      %cst_18 = arith.constant 0.000000e+00 : f32
      %25 = vector.broadcast %cst_18 : f32 to vector<16x1xf32>
      %c0_19 = arith.constant 0 : index
      %c0_20 = arith.constant 0 : index
      %26 = vector.load %arg6[%c0_19, %c0_20] : memref<16x1xf32, #tpu.memory_space<vmem>>, vector<16x1xf32>
      tpu.vector_store %arg6[%c0_19, %c0_20], %25 {strides = array<i32>} : memref<16x1xf32, #tpu.memory_space<vmem>>, vector<16x1xf32>,
      %cst_21 = arith.constant 0.000000e+00 : f32
      %27 = vector.broadcast %cst_21 : f32 to vector<16x1xf32>
      %c0_22 = arith.constant 0 : index
      %c0_23 = arith.constant 0 : index
      %28 = vector.load %arg7[%c0_22, %c0_23] : memref<16x1xf32, #tpu.memory_space<vmem>>, vector<16x1xf32>
      tpu.vector_store %arg7[%c0_22, %c0_23], %27 {strides = array<i32>} : memref<16x1xf32, #tpu.memory_space<vmem>>, vector<16x1xf32>,
    } else {
    }
    %c0 = arith.constant 0 : index
    %c0_1 = arith.constant 0 : index
    %3 = vector.load %arg2[%c0, %c0_1] : memref<16x4xf32, #tpu.memory_space<vmem>>, vector<16x4xf32>
    %c0_2 = arith.constant 0 : index
    %c0_3 = arith.constant 0 : index
    %c0_4 = arith.constant 0 : index
    %4 = vector.load %arg1[%c0_2, %c0_3, %c0_4] : memref<1x4x64xf32, #tpu.memory_space<vmem>>, vector<1x4x64xf32>
    %5 = vector.shape_cast %4 : vector<1x4x64xf32> to vector<4x64xf32>
    %cst = arith.constant dense<0.000000e+00> : vector<16x64xf32>
    %6 = tpu.matmul %3, %5, %cst {dimension_numbers = #tpu.dot_dimension_numbers<[1], [0], [0], [1], [0, 0, 1, 1], [], []>} : vector<16x4xf32>, vector<4x64xf32>, vector<16x64xf32> -> vector<16x64xf32>
    %7 = arith.index_cast %arg0 : i32 to index
    %c0_5 = arith.constant 0 : index
    %c0_6 = arith.constant 0 : index
    %8 = vector.load %arg5[%7, %c0_5, %c0_6] : memref<2x16x64xf32, #tpu.memory_space<vmem>>, vector<1x16x64xf32>
    %9 = vector.shape_cast %8 : vector<1x16x64xf32> to vector<16x64xf32>
    %10 = vector.shape_cast %6 : vector<16x64xf32> to vector<1x16x64xf32>
    tpu.vector_store %arg5[%7, %c0_5, %c0_6], %10 {strides = array<i32>} : memref<2x16x64xf32, #tpu.memory_space<vmem>>, vector<1x16x64xf32>,
    %c0_7 = arith.constant 0 : index
    %c0_8 = arith.constant 0 : index
    %11 = vector.load %arg6[%c0_7, %c0_8] : memref<16x1xf32, #tpu.memory_space<vmem>>, vector<16x1xf32>
    %cst_9 = arith.constant dense<0.000000e+00> : vector<16xf32>
    %12 = vector.multi_reduction <add>, %6, %cst_9 [1] : vector<16x64xf32> to vector<16xf32>
    %13 = vector.shape_cast %12 : vector<16xf32> to vector<16x1xf32>
    %14 = arith.addf %11, %13 : vector<16x1xf32>
    %c0_10 = arith.constant 0 : index
    %c0_11 = arith.constant 0 : index
    %15 = vector.load %arg6[%c0_10, %c0_11] : memref<16x1xf32, #tpu.memory_space<vmem>>, vector<16x1xf32>
    tpu.vector_store %arg6[%c0_10, %c0_11], %14 {strides = array<i32>} : memref<16x1xf32, #tpu.memory_space<vmem>>, vector<16x1xf32>,
    %c0_12 = arith.constant 0 : index
    %c0_13 = arith.constant 0 : index
    %16 = vector.load %arg7[%c0_12, %c0_13] : memref<16x1xf32, #tpu.memory_space<vmem>>, vector<16x1xf32>
    %17 = arith.mulf %6, %6 : vector<16x64xf32>
    %cst_14 = arith.constant dense<0.000000e+00> : vector<16xf32>
    %18 = vector.multi_reduction <add>, %17, %cst_14 [1] : vector<16x64xf32> to vector<16xf32>
    %19 = vector.shape_cast %18 : vector<16xf32> to vector<16x1xf32>
    %20 = arith.addf %16, %19 : vector<16x1xf32>
    %c0_15 = arith.constant 0 : index
    %c0_16 = arith.constant 0 : index
    %21 = vector.load %arg7[%c0_15, %c0_16] : memref<16x1xf32, #tpu.memory_space<vmem>>, vector<16x1xf32>
    tpu.vector_store %arg7[%c0_15, %c0_16], %20 {strides = array<i32>} : memref<16x1xf32, #tpu.memory_space<vmem>>, vector<16x1xf32>,
    %c1_i32 = arith.constant 1 : i32
    %22 = arith.cmpi eq, %arg0, %c1_i32 : i32
    %23 = arith.extui %22 : i1 to i32
    %c0_i32_17 = arith.constant 0 : i32
    %24 = arith.cmpi ne, %23, %c0_i32_17 : i32
    scf.if %24 {
      %c0_18 = arith.constant 0 : index
      %c0_19 = arith.constant 0 : index
      %25 = vector.load %arg6[%c0_18, %c0_19] : memref<16x1xf32, #tpu.memory_space<vmem>>, vector<16x1xf32>
      %cst_20 = arith.constant 7.812500e-03 : f32
      %26 = vector.broadcast %cst_20 : f32 to vector<16x1xf32>
      %27 = arith.mulf %25, %26 : vector<16x1xf32>
      %c0_21 = arith.constant 0 : index
      %c0_22 = arith.constant 0 : index
      %28 = vector.load %arg7[%c0_21, %c0_22] : memref<16x1xf32, #tpu.memory_space<vmem>>, vector<16x1xf32>
      %cst_23 = arith.constant 7.812500e-03 : f32
      %29 = vector.broadcast %cst_23 : f32 to vector<16x1xf32>
      %30 = arith.mulf %28, %29 : vector<16x1xf32>
      %31 = arith.mulf %27, %27 : vector<16x1xf32>
      %32 = arith.subf %30, %31 : vector<16x1xf32>
      %c0_24 = arith.constant 0 : index
      %c0_25 = arith.constant 0 : index
      %33 = vector.load %arg3[%c0_24, %c0_25] : memref<16x1xf32, #tpu.memory_space<vmem>>, vector<16x1xf32>
      %cst_26 = arith.constant 9.99999974E-6 : f32
      %34 = vector.broadcast %cst_26 : f32 to vector<16x1xf32>
      %35 = arith.addf %32, %34 : vector<16x1xf32>
      %36 = math.rsqrt %35 : vector<16x1xf32>
      %37 = arith.mulf %33, %36 : vector<16x1xf32>
      %c0_27 = arith.constant 0 : index
      %c0_28 = arith.constant 0 : index
      %38 = vector.load %arg4[%c0_27, %c0_28] : memref<16x1xf32, #tpu.memory_space<vmem>>, vector<16x1xf32>
      %39 = arith.mulf %27, %37 : vector<16x1xf32>
      %40 = arith.subf %38, %39 : vector<16x1xf32>
      %c0_29 = arith.constant 0 : index
      %c0_30 = arith.constant 0 : index
      %c0_31 = arith.constant 0 : index
      %41 = vector.load %arg5[%c0_29, %c0_30, %c0_31] : memref<2x16x64xf32, #tpu.memory_space<vmem>>, vector<2x16x64xf32>
      %42 = vector.shape_cast %37 : vector<16x1xf32> to vector<1x16x1xf32>
      %43 = vector.broadcast %42 : vector<1x16x1xf32> to vector<2x16x64xf32>
      %44 = arith.mulf %41, %43 : vector<2x16x64xf32>
      %45 = vector.shape_cast %40 : vector<16x1xf32> to vector<1x16x1xf32>
      %46 = vector.broadcast %45 : vector<1x16x1xf32> to vector<2x16x64xf32>
      %47 = arith.addf %44, %46 : vector<2x16x64xf32>
      %c0_32 = arith.constant 0 : index
      %c0_33 = arith.constant 0 : index
      %c0_34 = arith.constant 0 : index
      %48 = vector.load %arg5[%c0_32, %c0_33, %c0_34] : memref<2x16x64xf32, #tpu.memory_space<vmem>>, vector<2x16x64xf32>
      tpu.vector_store %arg5[%c0_32, %c0_33, %c0_34], %47 {strides = array<i32>} : memref<2x16x64xf32, #tpu.memory_space<vmem>>, vector<2x16x64xf32>,
    } else {
    }
    return
  }
  func.func @transform_0(%arg0: i32) -> (i32, i32, i32) {
    %c0_i32 = arith.constant 0 : i32
    %c0_i32_0 = arith.constant 0 : i32
    %c0_i32_1 = arith.constant 0 : i32
    return %arg0, %c0_i32, %c0_i32_0 : i32, i32, i32
  }
  func.func @transform_1(%arg0: i32) -> (i32, i32) {
    %c0_i32 = arith.constant 0 : i32
    %c0_i32_0 = arith.constant 0 : i32
    %c0_i32_1 = arith.constant 0 : i32
    return %c0_i32, %c0_i32_0 : i32, i32
  }
  func.func @transform_2(%arg0: i32) -> (i32, i32) {
    %c0_i32 = arith.constant 0 : i32
    %c0_i32_0 = arith.constant 0 : i32
    %c0_i32_1 = arith.constant 0 : i32
    return %c0_i32, %c0_i32_0 : i32, i32
  }
  func.func @transform_3(%arg0: i32) -> (i32, i32) {
    %c0_i32 = arith.constant 0 : i32
    %c0_i32_0 = arith.constant 0 : i32
    %c0_i32_1 = arith.constant 0 : i32
    return %c0_i32, %c0_i32_0 : i32, i32
  }
  func.func @transform_4(%arg0: i32) -> (i32, i32, i32) {
    %c0_i32 = arith.constant 0 : i32
    %c0_i32_0 = arith.constant 0 : i32
    %c0_i32_1 = arith.constant 0 : i32
    %c0_i32_2 = arith.constant 0 : i32
    return %c0_i32, %c0_i32_0, %c0_i32_1 : i32, i32, i32
  }
}

</mosaic_0001>

<bundles_post_ra>
// kernel: shortcut_projection.1
= control target key start
LH: loop header
LB: loop body
LE: loop exit
PB: predicated region body
PF: predicated region fallthrough
CT: control target
= control target key end

     0   :  { %s478_s15 = smov 0   ;;  %s554_s0 = inlined_call_operand.vmem [shape: f32[2,4,64], index: 0, kind: input, shape index: {}]   ;;  %s555_s1 = inlined_call_operand.vmem [shape: f32[16,4], index: 1, kind: input, shape index: {}]   ;;  %s556_s2 = inlined_call_operand.vmem [shape: f32[16,1], index: 2, kind: input, shape index: {}]   ;;  %s557_s3 = inlined_call_operand.vmem [shape: f32[16,1], index: 3, kind: input, shape index: {}]   ;;  %s558_s4 = inlined_call_operand.vmem [shape: f32[2,16,64], index: 4, kind: output, shape index: {}]  }
   0x1 LB: > { %s484_s16 = sadd.s32 4294967295, %s449_s15   ;;  %p409_p0 = scmp.ge.s32.totalorder %s449_s15, 1  ;;  %s449_s15 = sphi %s478_s15, %s14_s15  }
   0x2   : > { %p156_p1 = scmp.lt.s32.totalorder %s449_s15, 3 }
   0x4   : > { %p157_p2 = pnand %p409_p0, %p156_p1 }
   0x5   : > { %p176_p3 = scmp.lt.s32.totalorder (!%p157_p2), %s484_s16, 1  ;;  %p411_p4 = scmp.ne.s32.totalorder (!%p157_p2), %s484_s16, 0 }
   0x6   : > { %160 = sbr.rel (%p157_p2) target bundleno = 526 (0x20e), region = 36 }
   0xb   : > { %s177_s17 = scalar_select %p176_p3, %s484_s16, 1 }
   0xc   : > { %183 = sbr.rel (%p411_p4) target bundleno = 20 (0x14), region = 40 }
   0xd   : > { %s410_s18 = sshll.u32 %s177_s17, 2 }
   0xe   : > { %s179_s21 = scalar_lea.vmem %s554_s0, %s410_s18 }
  0x11   : > { %vm184_vm0 = vcmask 7168   ;;  %v451_v0 = vmov 0.0  }
  0x12   : > { %185 = vst.msk [vmem:[#allocation2] sm:$0xff] %vm184_vm0, %v451_v0  ;;  %186 = vst.msk [vmem:[#allocation2 + $0x8] sm:$0xff] %vm184_vm0, %v451_v0 }
  0x13   : > { %187 = vst.msk [vmem:[#allocation3] sm:$0xff] %vm184_vm0, %v451_v0  ;;  %188 = vst.msk [vmem:[#allocation3 + $0x8] sm:$0xff] %vm184_vm0, %v451_v0 }
  0x14 PF: > { %v191_v1 = vld [vmem:[%s179_s21] sm:$0xf]  ;;  %vm199_vm1 = vcmask 1043456   ;;  %vm192_vm2 = vcmask 31744   ;;  %v190_v3 = vld [vmem:[%s555_s1 + $0x8] sm:$0xff]  ;;  %s415_s26 = sshll.u32 %s484_s16, 4 }
  0x15   : > { %v189_v2 = vld [vmem:[%s555_s1] sm:$0xff]  ;;  %422 = vmatprep.subr.msk.mxu0 %vm199_vm1, %v191_v1  ;;  %s279_s29 = scalar_lea.vmem %s558_s4, %s415_s26  ;;  %vm280_vm3 = vcmask 523264   ;;  %vm293_vm4 = vcmask 7168   ;;  %p416_p5 = scmp.ne.s32.totalorder %s484_s16, 1 }
  0x16   : > { %424 = vmatprep.mubr.msk.f32.mxu0 %vm192_vm2, %v189_v2  ;;  %423 = vmatpush3.msk.msra.mxu0 %vm199_vm1, %v191_v1 }
  0x17   : > { %425 = vmatmul.mubr.msk.f32.vlgmr.msra.gmra.mxu0 %vm192_vm2, %v190_v3 }
  0x19   : > { %v283_v12 = vld [vmem:[#allocation2] sm:$0xff]  ;;  %v284_v17 = vld [vmem:[#allocation2 + $0x8] sm:$0xff] }
  0x1a   : > { %v296_v14 = vld [vmem:[#allocation3] sm:$0xff]  ;;  %v297_v20 = vld [vmem:[#allocation3 + $0x8] sm:$0xff] }
  0xd7   : > { %v426_v4 = vpop.f32.mrf.mxu0 }
  0xd8   : > { %282 = vst.msk [vmem:[%s279_s29 + $0x8] sm:$0xff] %vm280_vm3, %v426_v4  ;;  %v299_v9 = vmul.f32 %v426_v4, %v426_v4  ;;  %v288_v10 = vsel %vm280_vm3, %v426_v4, 0.0 }
  0xd9   : > { %v269_v5 = vpop.f32.mrf.mxu0 }
  0xda   : > { %281 = vst.msk [vmem:[%s279_s29] sm:$0xff] %vm280_vm3, %v269_v5  ;;  %v285_v6 = vsel %vm280_vm3, %v269_v5, 0.0  ;;  %v298_v7 = vmul.f32 %v269_v5, %v269_v5  ;;  %v303_v11 = vsel %vm280_vm3, %v299_v9, 0.0 }
  0xdb   : > { %286 = vadd.xlane.f32.xlu0 %v285_v6 }
  0xdc   : > { %v300_v8 = vsel %vm280_vm3, %v298_v7, 0.0 }
  0xdd   : > { %301 = vadd.xlane.f32.xlu1 %v300_v8 }
  0xdf   : > { %289 = vadd.xlane.f32.xlu0 %v288_v10 }
  0xe1   : > { %304 = vadd.xlane.f32.xlu1 %v303_v11 }
 0x164   : > { %v287_v13 = vpop.xlane.xlu0 %286 }
 0x165   : > { %v291_v15 = vadd.f32 %v287_v13, %v283_v12 }
 0x166   : > { %v302_v16 = vpop.xlane.xlu1 %301 }
 0x167   : > { %294 = vst.msk [vmem:[#allocation2] sm:$0xff] %vm293_vm4, %v291_v15  ;;  %v306_v18 = vadd.f32 %v302_v16, %v296_v14 }
 0x168   : > { %v290_v19 = vpop.xlane.xlu0 %289 }
 0x169   : > { %308 = vst.msk [vmem:[#allocation3] sm:$0xff] %vm293_vm4, %v306_v18  ;;  %v292_v21 = vadd.f32 %v290_v19, %v284_v17  ;;  %313 = sbr.rel (%p416_p5) target bundleno = 526 (0x20e), region = 44 }
 0x16a   : > { %v305_v22 = vpop.xlane.xlu1 %304 }
 0x16b   : > { %295 = vst.msk [vmem:[#allocation2 + $0x8] sm:$0xff] %vm293_vm4, %v292_v21  ;;  %v307_v23 = vadd.f32 %v305_v22, %v297_v20 }
 0x16d   : > { %309 = vst.msk [vmem:[#allocation3 + $0x8] sm:$0xff] %vm293_vm4, %v307_v23 }
 0x16e   : > { %v314_v24 = vld [vmem:[#allocation2] sm:$0xff]  ;;  %v452_v26 = vmov 0   ;;  %v327_v40 = vld [vmem:[%s556_s2 + $0x8] sm:$0xff]  ;;  %v342_v52 = vld [vmem:[%s558_s4 + $0x10] sm:$0xff] }
 0x16f   : > { %437 = vset.pattern.permute.xlu0 %v452_v26  ;;  %v316_v27 = vmul.f32 0.0078125, %v314_v24  ;;  %438 = vset.pattern.permute.xlu1 %v452_v26  ;;  %v326_v39 = vld [vmem:[%s556_s2] sm:$0xff]  ;;  %v335_v47 = vld [vmem:[%s557_s3 + $0x8] sm:$0xff]  ;;  %v343_v57 = vld [vmem:[%s558_s4 + $0x18] sm:$0xff] }
 0x170   : > { %v318_v25 = vld [vmem:[#allocation3] sm:$0xff]  ;;  %v334_v45 = vld [vmem:[%s557_s3] sm:$0xff]  ;;  %v341_v56 = vld [vmem:[%s558_s4 + $0x8] sm:$0xff] }
 0x171   : > { %v320_v28 = vmul.f32 0.0078125, %v318_v25  ;;  %v322_v33 = vmul.f32 %v316_v27, %v316_v27  ;;  %v340_v51 = vld [vmem:[%s558_s4] sm:$0xff] }
 0x172   : > { %v315_v29 = vld [vmem:[#allocation2 + $0x8] sm:$0xff] }
 0x173   : > { %v317_v31 = vmul.f32 0.0078125, %v315_v29  ;;  %v324_v35 = vsub.f32 %v320_v28, %v322_v33 }
 0x174   : > { %v319_v30 = vld [vmem:[#allocation3 + $0x8] sm:$0xff] }
 0x175   : > { %v321_v32 = vmul.f32 0.0078125, %v319_v30  ;;  %v323_v34 = vmul.f32 %v317_v31, %v317_v31  ;;  %v328_v37 = vadd.f32 1e-05, %v324_v35 }
 0x177   : > { %v325_v36 = vsub.f32 %v321_v32, %v323_v34  ;;  %439 = vrsqrt.f32 %v328_v37 }
 0x179   : > { %v329_v38 = vadd.f32 1e-05, %v325_v36 }
 0x17b   : > { %441 = vrsqrt.f32 %v329_v38 }
 0x184   : > { %v440_v41 = vpop.eup %439 }
 0x185   : > { %v332_v43 = vmul.f32 %v440_v41, %v326_v39 }
 0x187   : > { %346 = vperm.xlu0 %437, %v332_v43   ;;  %v336_v46 = vmul.f32 %v332_v43, %v316_v27 }
 0x188   : > { %v442_v42 = vpop.eup %441 }
 0x189   : > { %v333_v44 = vmul.f32 %v442_v42, %v327_v40  ;;  %v338_v49 = vsub.f32 %v334_v45, %v336_v46 }
 0x18b   : > { %v337_v48 = vmul.f32 %v333_v44, %v317_v31  ;;  %351 = vperm.xlu0 %437, %v333_v44   ;;  %360 = vperm.xlu1 %438, %v338_v49  }
 0x18d   : > { %v339_v50 = vsub.f32 %v335_v47, %v337_v48 }
 0x18f   : > { %365 = vperm.xlu1 %438, %v339_v50  }
 0x202   : > { %v347_v53 = vpop.permute.xlu0 %346 }
 0x203   : > { %v354_v54 = vmul.f32 %v347_v53, %v340_v51  ;;  %v356_v55 = vmul.f32 %v347_v53, %v342_v52 }
 0x206   : > { %v352_v58 = vpop.permute.xlu0 %351  ;;  %v361_v59 = vpop.permute.xlu1 %360 }
 0x207   : > { %v368_v60 = vadd.f32 %v361_v59, %v354_v54  ;;  %v370_v61 = vadd.f32 %v361_v59, %v356_v55  ;;  %v355_v62 = vmul.f32 %v352_v58, %v341_v56  ;;  %v357_v63 = vmul.f32 %v352_v58, %v343_v57 }
 0x209   : > { %372 = vst.msk [vmem:[%s558_s4] sm:$0xff] %vm280_vm3, %v368_v60  ;;  %374 = vst.msk [vmem:[%s558_s4 + $0x10] sm:$0xff] %vm280_vm3, %v370_v61 }
 0x20a   : > { %v366_v0 = vpop.permute.xlu1 %365 }
 0x20b   : > { %v369_v1 = vadd.f32 %v366_v0, %v355_v62  ;;  %v371_v2 = vadd.f32 %v366_v0, %v357_v63 }
 0x20d   : > { %373 = vst.msk [vmem:[%s558_s4 + $0x8] sm:$0xff] %vm280_vm3, %v369_v1  ;;  %375 = vst.msk [vmem:[%s558_s4 + $0x18] sm:$0xff] %vm280_vm3, %v371_v2 }
 0x20e PF: > { %s14_s15 = sadd.s32 1, %s449_s15  }
 0x20f   : > { %p11_p6 = scmp.ge.s32.totalorder %s14_s15, 4  }
 0x211   :  { %13 = sbr.rel (!%p11_p6) target bundleno = 1 (0x1), region = 71 }

</bundles_post_ra>
